<compile_context>
chip_gen: v5e
topology: v5e:2x2
jax: 0.10.0
libtpu: 0.0.40
codegen_flags: <defaults>
</compile_context>

<pallas_src>
import functools

import numpy as np
import jax
import jax.numpy as jnp
from jax.experimental import pallas as pl
from jax.experimental.pallas import tpu as pltpu


NEG_BIG = -1e30  # padded action lanes: exp underflows to exactly 0, never wins the max


def _round_up(x, m):
    return ((x + m - 1) // m) * m


def _cat_head_kernel(x_ref, w_ref, b_ref, o_ref, *, seg_len, num_segments):
    """Compute one (TM, TO) output tile, TO = num_segments * seg_len.

    x_ref: (TM, D)  bf16   activation row tile
    w_ref: (D, TO)  bf16   weight tile (canonical K,N layout, pre-scaled by 1/T)
    b_ref: (1, TO)  f32    bias tile (pre-scaled by 1/T, padded lanes = NEG_BIG)
    o_ref: (TM, TO) f32    per-segment log-softmax
    """
    xs = x_ref[...]
    for s in range(num_segments):              # S is tiny; fully unrolled
        lo = s * seg_len
        hi = lo + seg_len
        # Per-segment matmul: live f32 temp is only (TM, seg_len); MXU push for the
        # next segment overlaps EUP exp/log + XLU reductions of this one.
        logits = jnp.dot(xs, w_ref[:, lo:hi], preferred_element_type=jnp.float32)
        logits = logits + b_ref[:, lo:hi]
        m = jnp.max(logits, axis=-1, keepdims=True)
        shifted = logits - m
        lse = jnp.log(jnp.sum(jnp.exp(shifted), axis=-1, keepdims=True))
        o_ref[:, lo:hi] = shifted - lse        # lane-aligned, unmasked store


def _tpu_vmem_and_cores():
    """Per-core VMEM capacity and whether the chip has 2 TensorCores (v7x)."""
    vmem_cap = 64 << 20  # conservative default (v7x per-core VMEM)
    try:
        info = pltpu.get_tpu_info()
        vmem_cap = int(getattr(info, "vmem_capacity_bytes", vmem_cap))
    except Exception:
        pass
    two_tc = False
    try:
        kind = jax.devices()[0].device_kind.lower().replace(" ", "")
        two_tc = ("v7" in kind) or ("tpu7" in kind)
    except Exception:
        pass
    return vmem_cap, two_tc


def categorical_action_head_forward(x, weight, bias, *, shape, num_actions,
                                    temperature=1.0, matmul_dtype=jnp.bfloat16):
    """x: (..., input_dim); weight: (out_features, input_dim) [PyTorch nn.Linear layout];
    bias: (out_features,).  Returns float32 log-probs of shape
    x.shape[:-1] + shape + (num_actions,)."""
    lead = x.shape[:-1]
    D = x.shape[-1]
    O = weight.shape[0]
    S = int(np.prod(shape)) if len(shape) else 1
    A = int(num_actions)
    assert O == S * A, (O, S, A)
    M = int(np.prod(lead)) if lead else 1
    inv_t = float(1.0 / temperature)

    # ---- parameter prep: fold 1/T, pad action axis to a multiple of 128,
    #      transpose to canonical (K, N), cast matmul operands to bf16. ----
    A_pad = _round_up(A, 128)
    O_pad = S * A_pad

    w = weight.astype(jnp.float32) * inv_t                       # (O, D)
    b = bias.astype(jnp.float32) * inv_t                         # (O,)
    if A_pad != A:
        w = jnp.pad(w.reshape(S, A, D), ((0, 0), (0, A_pad - A), (0, 0))).reshape(O_pad, D)
        b = jnp.pad(b.reshape(S, A), ((0, 0), (0, A_pad - A)),
                    constant_values=NEG_BIG).reshape(O_pad)
    wt = jnp.transpose(w).astype(matmul_dtype)                   # (D, O_pad)
    b2 = b.reshape(1, O_pad)                                     # f32

    xf = x.reshape(M, D).astype(matmul_dtype)

    # ---- generation-aware VMEM budget & tile selection ----
    vmem_cap, two_tc = _tpu_vmem_and_cores()
    budget = int(vmem_cap * 0.8)      # ~100 MiB on 128 MiB parts, ~51 MiB on v7x
    x_isz = jnp.dtype(matmul_dtype).itemsize
    w_isz = x_isz

    def _bytes_needed(tm, segs, single_w):
        to = segs * A_pad
        nbw = 1 if single_w else 2                 # single- vs double-buffered weight/bias
        w_b = nbw * to * (D * w_isz + 4)           # weight + bias tiles
        x_b = 2 * tm * D * x_isz                   # x row tile (double-buffered)
        o_b = 2 * tm * to * 4                      # f32 output tile (double-buffered)
        tmp = 4 * tm * A_pad * 4                   # per-segment softmax temporaries
        return w_b + x_b + o_b + tmp

    M_need = _round_up(max(M, 1), 8)
    if M_need <= 128:
        tm_cands = [M_need]
    else:
        cap = _round_up(M_need, 128)
        tm_cands = sorted({t for t in (1024, 768, 512, 384, 256, 128, cap) if t <= cap},
                          reverse=True)

    seg_divisors = [d for d in range(S, 0, -1) if S % d == 0]
    TM, segs_per_tile = tm_cands[-1], 1
    found = False
    for segs in seg_divisors:                       # prefer resident (un-tiled) weight
        for tm in tm_cands:                         # prefer the largest row tile
            if _bytes_needed(tm, segs, segs == S) <= budget:
                TM, segs_per_tile, found = tm, segs, True
                break
        if found:
            break

    grid_o = S // segs_per_tile

    # v7x has 2 TensorCores: a 1-step "parallel" grid leaves one core idle.
    if two_tc and grid_o * (_round_up(M, TM) // TM) == 1:
        if TM >= 256:
            TM = _round_up(TM // 2, 128)
        elif TM >= 16:
            TM = _round_up(TM // 2, 8)

    M_pad = _round_up(M, TM)
    if M_pad != M:
        xf = jnp.pad(xf, ((0, M_pad - M), (0, 0)))
    grid_m = M_pad // TM
    TO = segs_per_tile * A_pad

    need = _bytes_needed(TM, segs_per_tile, grid_o == 1)
    vmem_limit = int(min(vmem_cap - (2 << 20),
                         max(32 << 20, int(need * 1.5) + (4 << 20))))

    kernel = functools.partial(_cat_head_kernel, seg_len=A_pad,
                               num_segments=segs_per_tile)

    cost = pl.CostEstimate(
        flops=2 * M_pad * D * O_pad,
        transcendentals=M_pad * (O_pad + S),           # exp per element + log per segment
        bytes_accessed=(grid_o * M_pad * D * x_isz + O_pad * D * w_isz
                        + O_pad * 4 + 4 * M_pad * O_pad),
    )

    def _run(single_buffer_resident):
        def resident_spec(blk, imap):
            if single_buffer_resident:
                return pl.BlockSpec(blk, imap, pipeline_mode=pl.Buffered(1))
            return pl.BlockSpec(blk, imap)

        return pl.pallas_call(
            kernel,
            out_shape=jax.ShapeDtypeStruct((M_pad, O_pad), jnp.float32),
            grid_spec=pltpu.PrefetchScalarGridSpec(
                num_scalar_prefetch=0,
                grid=(grid_o, grid_m),                 # weight tile outer, rows inner
                in_specs=[
                    pl.BlockSpec((TM, D), lambda j, i: (i, 0)),      # x: streamed rows
                    resident_spec((D, TO), lambda j, i: (0, j)),     # weight
                    resident_spec((1, TO), lambda j, i: (0, j)),     # bias
                ],
                out_specs=pl.BlockSpec((TM, TO), lambda j, i: (i, j)),
            ),
            compiler_params=pltpu.CompilerParams(
                dimension_semantics=("parallel", "parallel"),
                vmem_limit_bytes=vmem_limit,
            ),
            cost_estimate=cost,
        )(xf, wt, b2)

    want_single = (grid_o == 1) and hasattr(pl, "Buffered")
    if want_single:
        try:
            out_flat = _run(True)
        except Exception:
            out_flat = _run(False)   # fall back to default double-buffering
    else:
        out_flat = _run(False)

    out = out_flat[:M] if M_pad != M else out_flat
    if A_pad != A:
        out = out.reshape(M, S, A_pad)[:, :, :A]
    return out.reshape(lead + tuple(shape) + (A,))


if __name__ == "__main__":
    # Small shapes consistent with the module (steve1 camera-style head):
    #   x: (batch=2, seq=8, input_dim=32); shape=(2,), num_actions=121 (exercises the
    #   128-lane padding path); temperature=2.0 -> out_features = 2*121 = 242.
    B, T, D = 2, 8, 32
    HEAD_SHAPE = (2,)
    NUM_ACTIONS = 121
    TEMPERATURE = 2.0
    O = int(np.prod(HEAD_SHAPE)) * NUM_ACTIONS

    key = jax.random.PRNGKey(0)
    kx, kw, kb = jax.random.split(key, 3)

    x = jax.random.normal(kx, (B, T, D), dtype=jnp.float32)
    # Deterministic synthetic parameters (nn.Linear(input_dim, prod(output_shape))).
    weight = 0.02 * jax.random.normal(kw, (O, D), dtype=jnp.float32)   # (out, in)
    bias = 0.01 * jax.random.normal(kb, (O,), dtype=jnp.float32)

    out = categorical_action_head_forward(
        x, weight, bias,
        shape=HEAD_SHAPE, num_actions=NUM_ACTIONS, temperature=TEMPERATURE,
    )
    out = jax.block_until_ready(out)

    # Pure-JAX f32 reference (kernel uses bf16 MXU inputs with f32 accumulation, so
    # tolerance is loosened accordingly).
    ref_flat = x.reshape(-1, D) @ weight.T + bias
    ref = ref_flat.reshape((B, T) + HEAD_SHAPE + (NUM_ACTIONS,)) / TEMPERATURE
    ref = jax.nn.log_softmax(ref.astype(jnp.float32), axis=-1)

    assert out.shape == (B, T) + HEAD_SHAPE + (NUM_ACTIONS,)
    assert out.dtype == jnp.float32
    np.testing.assert_allclose(np.asarray(out), np.asarray(ref), atol=1e-2, rtol=1e-3)

    print("KERNEL_OK")
</pallas_src>

<mosaic_0001>
module attributes {stable_mosaic.version = 11 : i64} {
  func.func @_cat_head_kernel(%arg0: i32, %arg1: i32, %arg2: memref<16x32xbf16, #tpu.memory_space<vmem>>, %arg3: memref<32x256xbf16, #tpu.memory_space<vmem>>, %arg4: memref<1x256xf32, #tpu.memory_space<vmem>>, %arg5: memref<16x256xf32, #tpu.memory_space<vmem>>) attributes {dimension_semantics = [#tpu.dimension_semantics<parallel>, #tpu.dimension_semantics<parallel>], iteration_bounds = array<i64: 1, 1>, scalar_prefetch = 0 : i64, scratch_operands = 0 : i64, tpu.core_type = #tpu.core_type<tc>, window_params = [{transform_indices = @transform_0, window_bounds = array<i64: 16, 32>}, {pipeline_mode = #tpu.pipeline_mode<synchronous>, transform_indices = @transform_1, window_bounds = array<i64: 32, 256>}, {pipeline_mode = #tpu.pipeline_mode<synchronous>, transform_indices = @transform_2, window_bounds = array<i64: 1, 256>}, {transform_indices = @transform_3, window_bounds = array<i64: 16, 256>}]} {
    %c0 = arith.constant 0 : index
    %c0_0 = arith.constant 0 : index
    %0 = vector.load %arg2[%c0, %c0_0] : memref<16x32xbf16, #tpu.memory_space<vmem>>, vector<16x32xbf16>
    %c0_1 = arith.constant 0 : index
    %c0_2 = arith.constant 0 : index
    %1 = vector.load %arg3[%c0_1, %c0_2] : memref<32x256xbf16, #tpu.memory_space<vmem>>, vector<32x128xbf16>
    %cst = arith.constant dense<0.000000e+00> : vector<16x128xf32>
    %2 = tpu.matmul %0, %1, %cst {dimension_numbers = #tpu.dot_dimension_numbers<[1], [0], [0], [1], [0, 0, 1, 1], [], []>} : vector<16x32xbf16>, vector<32x128xbf16>, vector<16x128xf32> -> vector<16x128xf32>
    %c0_3 = arith.constant 0 : index
    %c0_4 = arith.constant 0 : index
    %3 = vector.load %arg4[%c0_3, %c0_4] : memref<1x256xf32, #tpu.memory_space<vmem>>, vector<1x128xf32>
    %4 = vector.broadcast %3 : vector<1x128xf32> to vector<16x128xf32>
    %5 = arith.addf %2, %4 : vector<16x128xf32>
    %cst_5 = arith.constant dense<0xFF800000> : vector<16xf32>
    %6 = vector.multi_reduction <maximumf>, %5, %cst_5 [1] : vector<16x128xf32> to vector<16xf32>
    %7 = vector.shape_cast %6 : vector<16xf32> to vector<16x1xf32>
    %8 = vector.broadcast %7 : vector<16x1xf32> to vector<16x128xf32>
    %9 = arith.subf %5, %8 : vector<16x128xf32>
    %10 = math.exp %9 : vector<16x128xf32>
    %cst_6 = arith.constant dense<0.000000e+00> : vector<16xf32>
    %11 = vector.multi_reduction <add>, %10, %cst_6 [1] : vector<16x128xf32> to vector<16xf32>
    %12 = vector.shape_cast %11 : vector<16xf32> to vector<16x1xf32>
    %13 = math.log %12 : vector<16x1xf32>
    %14 = vector.broadcast %13 : vector<16x1xf32> to vector<16x128xf32>
    %15 = arith.subf %9, %14 : vector<16x128xf32>
    %c0_7 = arith.constant 0 : index
    %c0_8 = arith.constant 0 : index
    %16 = vector.load %arg5[%c0_7, %c0_8] : memref<16x256xf32, #tpu.memory_space<vmem>>, vector<16x128xf32>
    tpu.vector_store %arg5[%c0_7, %c0_8], %15 {strides = array<i32>} : memref<16x256xf32, #tpu.memory_space<vmem>>, vector<16x128xf32>,
    %c0_9 = arith.constant 0 : index
    %c128 = arith.constant 128 : index
    %17 = vector.load %arg3[%c0_9, %c128] : memref<32x256xbf16, #tpu.memory_space<vmem>>, vector<32x128xbf16>
    %cst_10 = arith.constant dense<0.000000e+00> : vector<16x128xf32>
    %18 = tpu.matmul %0, %17, %cst_10 {dimension_numbers = #tpu.dot_dimension_numbers<[1], [0], [0], [1], [0, 0, 1, 1], [], []>} : vector<16x32xbf16>, vector<32x128xbf16>, vector<16x128xf32> -> vector<16x128xf32>
    %c0_11 = arith.constant 0 : index
    %c128_12 = arith.constant 128 : index
    %19 = vector.load %arg4[%c0_11, %c128_12] : memref<1x256xf32, #tpu.memory_space<vmem>>, vector<1x128xf32>
    %20 = vector.broadcast %19 : vector<1x128xf32> to vector<16x128xf32>
    %21 = arith.addf %18, %20 : vector<16x128xf32>
    %cst_13 = arith.constant dense<0xFF800000> : vector<16xf32>
    %22 = vector.multi_reduction <maximumf>, %21, %cst_13 [1] : vector<16x128xf32> to vector<16xf32>
    %23 = vector.shape_cast %22 : vector<16xf32> to vector<16x1xf32>
    %24 = vector.broadcast %23 : vector<16x1xf32> to vector<16x128xf32>
    %25 = arith.subf %21, %24 : vector<16x128xf32>
    %26 = math.exp %25 : vector<16x128xf32>
    %cst_14 = arith.constant dense<0.000000e+00> : vector<16xf32>
    %27 = vector.multi_reduction <add>, %26, %cst_14 [1] : vector<16x128xf32> to vector<16xf32>
    %28 = vector.shape_cast %27 : vector<16xf32> to vector<16x1xf32>
    %29 = math.log %28 : vector<16x1xf32>
    %30 = vector.broadcast %29 : vector<16x1xf32> to vector<16x128xf32>
    %31 = arith.subf %25, %30 : vector<16x128xf32>
    %c0_15 = arith.constant 0 : index
    %c128_16 = arith.constant 128 : index
    %32 = vector.load %arg5[%c0_15, %c128_16] : memref<16x256xf32, #tpu.memory_space<vmem>>, vector<16x128xf32>
    tpu.vector_store %arg5[%c0_15, %c128_16], %31 {strides = array<i32>} : memref<16x256xf32, #tpu.memory_space<vmem>>, vector<16x128xf32>,
    return
  }
  func.func @transform_0(%arg0: i32, %arg1: i32) -> (i32, i32) {
    %c0_i32 = arith.constant 0 : i32
    %c0_i32_0 = arith.constant 0 : i32
    return %arg1, %c0_i32 : i32, i32
  }
  func.func @transform_1(%arg0: i32, %arg1: i32) -> (i32, i32) {
    %c0_i32 = arith.constant 0 : i32
    %c0_i32_0 = arith.constant 0 : i32
    return %c0_i32, %arg0 : i32, i32
  }
  func.func @transform_2(%arg0: i32, %arg1: i32) -> (i32, i32) {
    %c0_i32 = arith.constant 0 : i32
    %c0_i32_0 = arith.constant 0 : i32
    return %c0_i32, %arg0 : i32, i32
  }
  func.func @transform_3(%arg0: i32, %arg1: i32) -> (i32, i32) {
    %c0_i32 = arith.constant 0 : i32
    return %arg1, %arg0 : i32, i32
  }
}

module attributes {stable_mosaic.version = 11 : i64} {
  func.func @_cat_head_kernel(%arg0: i32, %arg1: i32, %arg2: memref<16x32xbf16, #tpu.memory_space<vmem>>, %arg3: memref<32x256xbf16, #tpu.memory_space<vmem>>, %arg4: memref<1x256xf32, #tpu.memory_space<vmem>>, %arg5: memref<16x256xf32, #tpu.memory_space<vmem>>) attributes {dimension_semantics = [#tpu.dimension_semantics<parallel>, #tpu.dimension_semantics<parallel>], iteration_bounds = array<i64: 1, 1>, scalar_prefetch = 0 : i64, scratch_operands = 0 : i64, tpu.core_type = #tpu.core_type<tc>, window_params = [{transform_indices = @transform_0, window_bounds = array<i64: 16, 32>}, {transform_indices = @transform_1, window_bounds = array<i64: 32, 256>}, {transform_indices = @transform_2, window_bounds = array<i64: 1, 256>}, {transform_indices = @transform_3, window_bounds = array<i64: 16, 256>}]} {
    %c0 = arith.constant 0 : index
    %c0_0 = arith.constant 0 : index
    %0 = vector.load %arg2[%c0, %c0_0] : memref<16x32xbf16, #tpu.memory_space<vmem>>, vector<16x32xbf16>
    %c0_1 = arith.constant 0 : index
    %c0_2 = arith.constant 0 : index
    %1 = vector.load %arg3[%c0_1, %c0_2] : memref<32x256xbf16, #tpu.memory_space<vmem>>, vector<32x128xbf16>
    %cst = arith.constant dense<0.000000e+00> : vector<16x128xf32>
    %2 = tpu.matmul %0, %1, %cst {dimension_numbers = #tpu.dot_dimension_numbers<[1], [0], [0], [1], [0, 0, 1, 1], [], []>} : vector<16x32xbf16>, vector<32x128xbf16>, vector<16x128xf32> -> vector<16x128xf32>
    %c0_3 = arith.constant 0 : index
    %c0_4 = arith.constant 0 : index
    %3 = vector.load %arg4[%c0_3, %c0_4] : memref<1x256xf32, #tpu.memory_space<vmem>>, vector<1x128xf32>
    %4 = vector.broadcast %3 : vector<1x128xf32> to vector<16x128xf32>
    %5 = arith.addf %2, %4 : vector<16x128xf32>
    %cst_5 = arith.constant dense<0xFF800000> : vector<16xf32>
    %6 = vector.multi_reduction <maximumf>, %5, %cst_5 [1] : vector<16x128xf32> to vector<16xf32>
    %7 = vector.shape_cast %6 : vector<16xf32> to vector<16x1xf32>
    %8 = vector.broadcast %7 : vector<16x1xf32> to vector<16x128xf32>
    %9 = arith.subf %5, %8 : vector<16x128xf32>
    %10 = math.exp %9 : vector<16x128xf32>
    %cst_6 = arith.constant dense<0.000000e+00> : vector<16xf32>
    %11 = vector.multi_reduction <add>, %10, %cst_6 [1] : vector<16x128xf32> to vector<16xf32>
    %12 = vector.shape_cast %11 : vector<16xf32> to vector<16x1xf32>
    %13 = math.log %12 : vector<16x1xf32>
    %14 = vector.broadcast %13 : vector<16x1xf32> to vector<16x128xf32>
    %15 = arith.subf %9, %14 : vector<16x128xf32>
    %c0_7 = arith.constant 0 : index
    %c0_8 = arith.constant 0 : index
    %16 = vector.load %arg5[%c0_7, %c0_8] : memref<16x256xf32, #tpu.memory_space<vmem>>, vector<16x128xf32>
    tpu.vector_store %arg5[%c0_7, %c0_8], %15 {strides = array<i32>} : memref<16x256xf32, #tpu.memory_space<vmem>>, vector<16x128xf32>,
    %c0_9 = arith.constant 0 : index
    %c128 = arith.constant 128 : index
    %17 = vector.load %arg3[%c0_9, %c128] : memref<32x256xbf16, #tpu.memory_space<vmem>>, vector<32x128xbf16>
    %cst_10 = arith.constant dense<0.000000e+00> : vector<16x128xf32>
    %18 = tpu.matmul %0, %17, %cst_10 {dimension_numbers = #tpu.dot_dimension_numbers<[1], [0], [0], [1], [0, 0, 1, 1], [], []>} : vector<16x32xbf16>, vector<32x128xbf16>, vector<16x128xf32> -> vector<16x128xf32>
    %c0_11 = arith.constant 0 : index
    %c128_12 = arith.constant 128 : index
    %19 = vector.load %arg4[%c0_11, %c128_12] : memref<1x256xf32, #tpu.memory_space<vmem>>, vector<1x128xf32>
    %20 = vector.broadcast %19 : vector<1x128xf32> to vector<16x128xf32>
    %21 = arith.addf %18, %20 : vector<16x128xf32>
    %cst_13 = arith.constant dense<0xFF800000> : vector<16xf32>
    %22 = vector.multi_reduction <maximumf>, %21, %cst_13 [1] : vector<16x128xf32> to vector<16xf32>
    %23 = vector.shape_cast %22 : vector<16xf32> to vector<16x1xf32>
    %24 = vector.broadcast %23 : vector<16x1xf32> to vector<16x128xf32>
    %25 = arith.subf %21, %24 : vector<16x128xf32>
    %26 = math.exp %25 : vector<16x128xf32>
    %cst_14 = arith.constant dense<0.000000e+00> : vector<16xf32>
    %27 = vector.multi_reduction <add>, %26, %cst_14 [1] : vector<16x128xf32> to vector<16xf32>
    %28 = vector.shape_cast %27 : vector<16xf32> to vector<16x1xf32>
    %29 = math.log %28 : vector<16x1xf32>
    %30 = vector.broadcast %29 : vector<16x1xf32> to vector<16x128xf32>
    %31 = arith.subf %25, %30 : vector<16x128xf32>
    %c0_15 = arith.constant 0 : index
    %c128_16 = arith.constant 128 : index
    %32 = vector.load %arg5[%c0_15, %c128_16] : memref<16x256xf32, #tpu.memory_space<vmem>>, vector<16x128xf32>
    tpu.vector_store %arg5[%c0_15, %c128_16], %31 {strides = array<i32>} : memref<16x256xf32, #tpu.memory_space<vmem>>, vector<16x128xf32>,
    return
  }
  func.func @transform_0(%arg0: i32, %arg1: i32) -> (i32, i32) {
    %c0_i32 = arith.constant 0 : i32
    %c0_i32_0 = arith.constant 0 : i32
    return %arg1, %c0_i32 : i32, i32
  }
  func.func @transform_1(%arg0: i32, %arg1: i32) -> (i32, i32) {
    %c0_i32 = arith.constant 0 : i32
    %c0_i32_0 = arith.constant 0 : i32
    return %c0_i32, %arg0 : i32, i32
  }
  func.func @transform_2(%arg0: i32, %arg1: i32) -> (i32, i32) {
    %c0_i32 = arith.constant 0 : i32
    %c0_i32_0 = arith.constant 0 : i32
    return %c0_i32, %arg0 : i32, i32
  }
  func.func @transform_3(%arg0: i32, %arg1: i32) -> (i32, i32) {
    %c0_i32 = arith.constant 0 : i32
    return %arg1, %arg0 : i32, i32
  }
}

</mosaic_0001>

<bundles_post_ra>
// kernel: tpu_custom_call.1
= control target key start
LH: loop header
LB: loop body
LE: loop exit
PB: predicated region body
PF: predicated region fallthrough
CT: control target
= control target key end

     0   :  { %8 = vsyncpa [#allocation3], 0  ;;  %s403_s0 = inlined_call_operand.hbm [shape: bf16[16,32], index: 0, kind: input, shape index: {}]   ;;  %s404_s1 = inlined_call_operand.hbm [shape: bf16[32,256], index: 1, kind: input, shape index: {}]   ;;  %s405_s2 = inlined_call_operand.hbm [shape: f32[1,256], index: 2, kind: input, shape index: {}]   ;;  %s406_s3 = inlined_call_operand.hbm [shape: f32[16,256], index: 3, kind: output, shape index: {}]  }
   0x1   :  { %9 = vsyncpa [#allocation6], 0  ;;  %s28_s14 = sshll.u32 %s404_s1, 4  ;;  %s29_s14 = int_to_ptr.hbm [resolvable:$true] %s28_s14 }
   0x2   :  { %10 = vsyncpa [#allocation4], 0  ;;  %s361_s15 = smov [#allocation5]   ;;  %s15_s19 = sshll.u32 %s403_s0, 4  ;;  %s16_s19 = int_to_ptr.hbm [resolvable:$true] %s15_s19 }
   0x3   :  { %s30_s16 = sshll.u32 %s361_s15, 4  ;;  %s362_s20 = smov 128   ;;  %s31_s16 = int_to_ptr.vmem [resolvable:$true] %s30_s16 }
   0x4   :  { %s363_s21 = smov 8   ;;  %s364_s22 = smov [#allocation2]  }
   0x5   :  { %36 = dma.hbm_to_vmem [thread:$0]  %s29_s14, 512, %s31_s16, [#allocation6], %s362_s20, %s362_s20, %s363_s21  }
   0x6   :  { %s17_s23 = sshll.u32 %s364_s22, 4  ;;  %s365_s24 = smov 64   ;;  %s18_s23 = int_to_ptr.vmem [resolvable:$true] %s17_s23 }
   0x7   :  { %s366_s25 = smov 4   ;;  %s42_s27 = sshll.u32 %s405_s2, 4  ;;  %s43_s27 = int_to_ptr.hbm [resolvable:$true] %s42_s27 }
   0x8   :  { %23 = dma.hbm_to_vmem [thread:$0]  %s16_s19, 128, %s18_s23, [#allocation3], %s365_s24, %s365_s24, %s366_s25  }
   0x9   :  { %s367_s28 = smov [#allocation7]  }
   0xa   :  { %s44_s29 = sshll.u32 %s367_s28, 4  ;;  %s45_s29 = int_to_ptr.vmem [resolvable:$true] %s44_s29 }
   0xb   :  { %47 = dma.hbm_to_vmem [thread:$0]  %s43_s27, 32, %s45_s29, [#allocation6]  }
   0xc   :  { %355 = dma.done.wait [#allocation3], 128  }
   0xd   :  { %356 = vsyncadd [#allocation3], 4294967168 }
   0xe   :  { %357 = dma.done.wait [#allocation6], 544  }
   0xf   :  { %358 = vsyncadd [#allocation6], 4294966752  ;;  %v214_v0 = vld [vmem:[#allocation5 + $0x10] sm:$0xf]  ;;  %v228_v1 = vld [vmem:[#allocation5 + $0x14] sm:$0xf0] }
  0x10   :  { %v223_v2 = vld [vmem:[#allocation5 + $0x14] sm:$0xf]  ;;  %v215_v3 = vor.u32 %v228_v1, %v214_v0  ;;  %v230_v4 = vld [vmem:[#allocation5 + $0x18] sm:$0xf0]  ;;  %v210_v5 = vld [vmem:[#allocation5] sm:$0xf] }
  0x11   :  { %v227_v6 = vld [vmem:[#allocation5 + $0x4] sm:$0xf0]  ;;  %v224_v7 = vor.u32 %v230_v4, %v223_v2  ;;  %v219_v8 = vld [vmem:[#allocation5 + $0x4] sm:$0xf]  ;;  %v229_v9 = vld [vmem:[#allocation5 + $0x8] sm:$0xf0] }
  0x12   :  { %98 = vmatpush.bf16.msra.mxu0 %v215_v3  ;;  %v211_v10 = vor.u32 %v227_v6, %v210_v5  ;;  %v220_v11 = vor.u32 %v229_v9, %v219_v8  ;;  %v226_v12 = vld [vmem:[#allocation2] sm:$0xff]  ;;  %vm88_vm0 = vcmask 261120   ;;  %v241_v13 = vld [vmem:[#allocation7] ss:$0 sm:$0xff]  ;;  %v242_v14 = vld [vmem:[#allocation7 + $0x1] ss:$0 sm:$0xff] }
  0x13   :  { %154 = vmatpush.bf16.msra.mxu1 %v224_v7  ;;  %s368_s0 = smov [#allocation8]   ;;  %s190_s5 = sshll.u32 %s406_s3, 4  ;;  %s191_s5 = int_to_ptr.hbm [resolvable:$true] %s190_s5 }
  0x14   :  { %s188_s2 = sshll.u32 %s368_s0, 4  ;;  %s369_s6 = smov 256   ;;  %s189_s2 = int_to_ptr.vmem [resolvable:$true] %s188_s2 }
  0x15   :  { %s370_s7 = smov 16  }
  0x16   :  { %99 = vmatpush.bf16.msra.mxu0 %v211_v10 }
  0x17   :  { %155 = vmatpush.bf16.msra.mxu1 %v220_v11 }
  0x19   :  { %216 = vmatmul.msk.bf16.vlgmr.msra.gmra.mxu0 %vm88_vm0, %v226_v12 }
  0x1a   :  { %225 = vmatmul.msk.bf16.vlgmr.msra.gmra.mxu1 %vm88_vm0, %v226_v12 }
  0x96   :  { %v101_v15 = vpop.f32.mrf.mxu0 }
  0x97   :  { %v102_v16 = vadd.f32 %v241_v13, %v101_v15  ;;  %v157_v17 = vpop.f32.mrf.mxu1 }
  0x98   :  { %v158_v18 = vadd.f32 %v242_v14, %v157_v17 }
  0x99   :  { %106 = vmax.xlane.f32.xlu0 %v102_v16 }
  0x9a   :  { %162 = vmax.xlane.f32.xlu1 %v158_v18 }
  0x9e   :  { %v103_v19 = vpop.f32.mrf.mxu0 }
  0x9f   :  { %v104_v20 = vadd.f32 %v241_v13, %v103_v19  ;;  %v159_v21 = vpop.f32.mrf.mxu1 }
  0xa0   :  { %v160_v22 = vadd.f32 %v242_v14, %v159_v21 }
  0xa1   :  { %108 = vmax.xlane.f32.xlu0 %v104_v20 }
  0xa2   :  { %164 = vmax.xlane.f32.xlu1 %v160_v22 }
 0x10c   :  { %v107_v23 = vpop.xlane.xlu0 %106 }
 0x10d   :  { %v163_v24 = vpop.xlane.xlu1 %162  ;;  %v110_v25 = vsub.f32 %v102_v16, %v107_v23 }
 0x10e   :  { %v166_v26 = vsub.f32 %v158_v18, %v163_v24 }
 0x10f   :  { %v112_v27 = vmul.f32 1.442695, %v110_v25 }
 0x110   :  { %v168_v28 = vmul.f32 1.442695, %v166_v26 }
 0x111   :  { %243 = vpow2.f32 %v112_v27 }
 0x112   :  { %245 = vpow2.f32 %v168_v28 }
 0x114   :  { %v109_v29 = vpop.xlane.xlu0 %108 }
 0x115   :  { %v165_v30 = vpop.xlane.xlu1 %164  ;;  %v111_v31 = vsub.f32 %v104_v20, %v109_v29 }
 0x116   :  { %v167_v32 = vsub.f32 %v160_v22, %v165_v30 }
 0x117   :  { %v244_v33 = vpop.eup %243  ;;  %v114_v34 = vmul.f32 1.442695, %v111_v31 }
 0x118   :  { %v246_v35 = vpop.eup %245  ;;  %v170_v36 = vmul.f32 1.442695, %v167_v32  ;;  %116 = vadd.xlane.f32.xlu2 %v244_v33 }
 0x119   :  { %247 = vpow2.f32 %v114_v34  ;;  %172 = vadd.xlane.f32.xlu0 %v246_v35 }
 0x11a   :  { %249 = vpow2.f32 %v170_v36 }
 0x11f   :  { %v248_v37 = vpop.eup %247 }
 0x120   :  { %v250_v38 = vpop.eup %249  ;;  %118 = vadd.xlane.f32.xlu2 %v248_v37 }
 0x121   :  { %174 = vadd.xlane.f32.xlu1 %v250_v38 }
 0x18b   :  { %v117_v39 = vpop.xlane.xlu2 %116 }
 0x18c   :  { %251 = vlog2.f32 %v117_v39  ;;  %v173_v40 = vpop.xlane.xlu0 %172 }
 0x18d   :  { %253 = vlog2.f32 %v173_v40 }
 0x192   :  { %v252_v41 = vpop.eup %251 }
 0x193   :  { %v254_v42 = vpop.eup %253  ;;  %v121_v43 = vmul.f32 0.6931472, %v252_v41  ;;  %v119_v44 = vpop.xlane.xlu2 %118 }
 0x194   :  { %v177_v45 = vmul.f32 0.6931472, %v254_v42  ;;  %v175_v46 = vpop.xlane.xlu1 %174  ;;  %255 = vlog2.f32 %v119_v44 }
 0x195   :  { %v124_v47 = vsub.f32 %v110_v25, %v121_v43  ;;  %257 = vlog2.f32 %v175_v46 }
 0x196   :  { %v180_v48 = vsub.f32 %v166_v26, %v177_v45 }
 0x197   :  { %126 = vst [vmem:[#allocation8] sm:$0xff] %v124_v47 }
 0x198   :  { %182 = vst [vmem:[#allocation8 + $0x8] sm:$0xff] %v180_v48 }
 0x19a   :  { %v256_v49 = vpop.eup %255 }
 0x19b   :  { %v258_v50 = vpop.eup %257  ;;  %v123_v51 = vmul.f32 0.6931472, %v256_v49 }
 0x19c   :  { %v179_v52 = vmul.f32 0.6931472, %v258_v50 }
 0x19d   :  { %v125_v53 = vsub.f32 %v111_v31, %v123_v51 }
 0x19e   :  { %v181_v54 = vsub.f32 %v167_v32, %v179_v52 }
 0x19f   :  { %127 = vst [vmem:[#allocation8 + $0x10] sm:$0xff] %v125_v53 }
 0x1a0   :  { %183 = vst [vmem:[#allocation8 + $0x18] sm:$0xff] %v181_v54 }
 0x1a1   :  { %196 = dma.vmem_to_hbm [thread:$0]  %s189_s2, 512, %s191_s5, [#allocation4], %s369_s6, %s369_s6, %s370_s7  }
 0x1a2   :  { %359 = dma.done.wait [#allocation4], 512  }
 0x1a3   :  { %360 = vsyncadd [#allocation4], 4294966784 }
 0x1a4   :  { %201 = vsyncpa [#allocation3], 1 }
 0x1a5   :  { %202 = vsyncpa [#allocation6], 1 }
 0x1a6   :  { %203 = vsyncpa [#allocation4], 1 }

// kernel: tpu_custom_call.1
= control target key start
LH: loop header
LB: loop body
LE: loop exit
PB: predicated region body
PF: predicated region fallthrough
CT: control target
= control target key end

     0   :  { %8 = vsyncpa [#allocation3], 0  ;;  %s403_s0 = inlined_call_operand.hbm [shape: bf16[16,32], index: 0, kind: input, shape index: {}]   ;;  %s404_s1 = inlined_call_operand.hbm [shape: bf16[32,256], index: 1, kind: input, shape index: {}]   ;;  %s405_s2 = inlined_call_operand.hbm [shape: f32[1,256], index: 2, kind: input, shape index: {}]   ;;  %s406_s3 = inlined_call_operand.hbm [shape: f32[16,256], index: 3, kind: output, shape index: {}]  }
   0x1   :  { %9 = vsyncpa [#allocation6], 0  ;;  %s28_s14 = sshll.u32 %s404_s1, 4  ;;  %s29_s14 = int_to_ptr.hbm [resolvable:$true] %s28_s14 }
   0x2   :  { %10 = vsyncpa [#allocation4], 0  ;;  %s361_s15 = smov [#allocation5]   ;;  %s15_s19 = sshll.u32 %s403_s0, 4  ;;  %s16_s19 = int_to_ptr.hbm [resolvable:$true] %s15_s19 }
   0x3   :  { %s30_s16 = sshll.u32 %s361_s15, 4  ;;  %s362_s20 = smov 128   ;;  %s31_s16 = int_to_ptr.vmem [resolvable:$true] %s30_s16 }
   0x4   :  { %s363_s21 = smov 8   ;;  %s364_s22 = smov [#allocation2]  }
   0x5   :  { %36 = dma.hbm_to_vmem [thread:$0]  %s29_s14, 512, %s31_s16, [#allocation6], %s362_s20, %s362_s20, %s363_s21  }
   0x6   :  { %s17_s23 = sshll.u32 %s364_s22, 4  ;;  %s365_s24 = smov 64   ;;  %s18_s23 = int_to_ptr.vmem [resolvable:$true] %s17_s23 }
   0x7   :  { %s366_s25 = smov 4   ;;  %s42_s27 = sshll.u32 %s405_s2, 4  ;;  %s43_s27 = int_to_ptr.hbm [resolvable:$true] %s42_s27 }
   0x8   :  { %23 = dma.hbm_to_vmem [thread:$0]  %s16_s19, 128, %s18_s23, [#allocation3], %s365_s24, %s365_s24, %s366_s25  }
   0x9   :  { %s367_s28 = smov [#allocation7]  }
   0xa   :  { %s44_s29 = sshll.u32 %s367_s28, 4  ;;  %s45_s29 = int_to_ptr.vmem [resolvable:$true] %s44_s29 }
   0xb   :  { %47 = dma.hbm_to_vmem [thread:$0]  %s43_s27, 32, %s45_s29, [#allocation6]  }
   0xc   :  { %355 = dma.done.wait [#allocation3], 128  }
   0xd   :  { %356 = vsyncadd [#allocation3], 4294967168 }
   0xe   :  { %357 = dma.done.wait [#allocation6], 544  }
   0xf   :  { %358 = vsyncadd [#allocation6], 4294966752  ;;  %v214_v0 = vld [vmem:[#allocation5 + $0x10] sm:$0xf]  ;;  %v228_v1 = vld [vmem:[#allocation5 + $0x14] sm:$0xf0] }
  0x10   :  { %v223_v2 = vld [vmem:[#allocation5 + $0x14] sm:$0xf]  ;;  %v215_v3 = vor.u32 %v228_v1, %v214_v0  ;;  %v230_v4 = vld [vmem:[#allocation5 + $0x18] sm:$0xf0]  ;;  %v210_v5 = vld [vmem:[#allocation5] sm:$0xf] }
  0x11   :  { %v227_v6 = vld [vmem:[#allocation5 + $0x4] sm:$0xf0]  ;;  %v224_v7 = vor.u32 %v230_v4, %v223_v2  ;;  %v219_v8 = vld [vmem:[#allocation5 + $0x4] sm:$0xf]  ;;  %v229_v9 = vld [vmem:[#allocation5 + $0x8] sm:$0xf0] }
  0x12   :  { %98 = vmatpush.bf16.msra.mxu0 %v215_v3  ;;  %v211_v10 = vor.u32 %v227_v6, %v210_v5  ;;  %v220_v11 = vor.u32 %v229_v9, %v219_v8  ;;  %v226_v12 = vld [vmem:[#allocation2] sm:$0xff]  ;;  %vm88_vm0 = vcmask 261120   ;;  %v241_v13 = vld [vmem:[#allocation7] ss:$0 sm:$0xff]  ;;  %v242_v14 = vld [vmem:[#allocation7 + $0x1] ss:$0 sm:$0xff] }
  0x13   :  { %154 = vmatpush.bf16.msra.mxu1 %v224_v7  ;;  %s368_s0 = smov [#allocation8]   ;;  %s190_s5 = sshll.u32 %s406_s3, 4  ;;  %s191_s5 = int_to_ptr.hbm [resolvable:$true] %s190_s5 }
  0x14   :  { %s188_s2 = sshll.u32 %s368_s0, 4  ;;  %s369_s6 = smov 256   ;;  %s189_s2 = int_to_ptr.vmem [resolvable:$true] %s188_s2 }
  0x15   :  { %s370_s7 = smov 16  }
  0x16   :  { %99 = vmatpush.bf16.msra.mxu0 %v211_v10 }
  0x17   :  { %155 = vmatpush.bf16.msra.mxu1 %v220_v11 }
  0x19   :  { %216 = vmatmul.msk.bf16.vlgmr.msra.gmra.mxu0 %vm88_vm0, %v226_v12 }
  0x1a   :  { %225 = vmatmul.msk.bf16.vlgmr.msra.gmra.mxu1 %vm88_vm0, %v226_v12 }
  0x96   :  { %v101_v15 = vpop.f32.mrf.mxu0 }
  0x97   :  { %v102_v16 = vadd.f32 %v241_v13, %v101_v15  ;;  %v157_v17 = vpop.f32.mrf.mxu1 }
  0x98   :  { %v158_v18 = vadd.f32 %v242_v14, %v157_v17 }
  0x99   :  { %106 = vmax.xlane.f32.xlu0 %v102_v16 }
  0x9a   :  { %162 = vmax.xlane.f32.xlu1 %v158_v18 }
  0x9e   :  { %v103_v19 = vpop.f32.mrf.mxu0 }
  0x9f   :  { %v104_v20 = vadd.f32 %v241_v13, %v103_v19  ;;  %v159_v21 = vpop.f32.mrf.mxu1 }
  0xa0   :  { %v160_v22 = vadd.f32 %v242_v14, %v159_v21 }
  0xa1   :  { %108 = vmax.xlane.f32.xlu0 %v104_v20 }
  0xa2   :  { %164 = vmax.xlane.f32.xlu1 %v160_v22 }
 0x10c   :  { %v107_v23 = vpop.xlane.xlu0 %106 }
 0x10d   :  { %v163_v24 = vpop.xlane.xlu1 %162  ;;  %v110_v25 = vsub.f32 %v102_v16, %v107_v23 }
 0x10e   :  { %v166_v26 = vsub.f32 %v158_v18, %v163_v24 }
 0x10f   :  { %v112_v27 = vmul.f32 1.442695, %v110_v25 }
 0x110   :  { %v168_v28 = vmul.f32 1.442695, %v166_v26 }
 0x111   :  { %243 = vpow2.f32 %v112_v27 }
 0x112   :  { %245 = vpow2.f32 %v168_v28 }
 0x114   :  { %v109_v29 = vpop.xlane.xlu0 %108 }
 0x115   :  { %v165_v30 = vpop.xlane.xlu1 %164  ;;  %v111_v31 = vsub.f32 %v104_v20, %v109_v29 }
 0x116   :  { %v167_v32 = vsub.f32 %v160_v22, %v165_v30 }
 0x117   :  { %v244_v33 = vpop.eup %243  ;;  %v114_v34 = vmul.f32 1.442695, %v111_v31 }
 0x118   :  { %v246_v35 = vpop.eup %245  ;;  %v170_v36 = vmul.f32 1.442695, %v167_v32  ;;  %116 = vadd.xlane.f32.xlu2 %v244_v33 }
 0x119   :  { %247 = vpow2.f32 %v114_v34  ;;  %172 = vadd.xlane.f32.xlu0 %v246_v35 }
 0x11a   :  { %249 = vpow2.f32 %v170_v36 }
 0x11f   :  { %v248_v37 = vpop.eup %247 }
 0x120   :  { %v250_v38 = vpop.eup %249  ;;  %118 = vadd.xlane.f32.xlu2 %v248_v37 }
 0x121   :  { %174 = vadd.xlane.f32.xlu1 %v250_v38 }
 0x18b   :  { %v117_v39 = vpop.xlane.xlu2 %116 }
 0x18c   :  { %251 = vlog2.f32 %v117_v39  ;;  %v173_v40 = vpop.xlane.xlu0 %172 }
 0x18d   :  { %253 = vlog2.f32 %v173_v40 }
 0x192   :  { %v252_v41 = vpop.eup %251 }
 0x193   :  { %v254_v42 = vpop.eup %253  ;;  %v121_v43 = vmul.f32 0.6931472, %v252_v41  ;;  %v119_v44 = vpop.xlane.xlu2 %118 }
 0x194   :  { %v177_v45 = vmul.f32 0.6931472, %v254_v42  ;;  %v175_v46 = vpop.xlane.xlu1 %174  ;;  %255 = vlog2.f32 %v119_v44 }
 0x195   :  { %v124_v47 = vsub.f32 %v110_v25, %v121_v43  ;;  %257 = vlog2.f32 %v175_v46 }
 0x196   :  { %v180_v48 = vsub.f32 %v166_v26, %v177_v45 }
 0x197   :  { %126 = vst [vmem:[#allocation8] sm:$0xff] %v124_v47 }
 0x198   :  { %182 = vst [vmem:[#allocation8 + $0x8] sm:$0xff] %v180_v48 }
 0x19a   :  { %v256_v49 = vpop.eup %255 }
 0x19b   :  { %v258_v50 = vpop.eup %257  ;;  %v123_v51 = vmul.f32 0.6931472, %v256_v49 }
 0x19c   :  { %v179_v52 = vmul.f32 0.6931472, %v258_v50 }
 0x19d   :  { %v125_v53 = vsub.f32 %v111_v31, %v123_v51 }
 0x19e   :  { %v181_v54 = vsub.f32 %v167_v32, %v179_v52 }
 0x19f   :  { %127 = vst [vmem:[#allocation8 + $0x10] sm:$0xff] %v125_v53 }
 0x1a0   :  { %183 = vst [vmem:[#allocation8 + $0x18] sm:$0xff] %v181_v54 }
 0x1a1   :  { %196 = dma.vmem_to_hbm [thread:$0]  %s189_s2, 512, %s191_s5, [#allocation4], %s369_s6, %s369_s6, %s370_s7  }
 0x1a2   :  { %359 = dma.done.wait [#allocation4], 512  }
 0x1a3   :  { %360 = vsyncadd [#allocation4], 4294966784 }
 0x1a4   :  { %201 = vsyncpa [#allocation3], 1 }
 0x1a5   :  { %202 = vsyncpa [#allocation6], 1 }
 0x1a6   :  { %203 = vsyncpa [#allocation4], 1 }

</bundles_post_ra>
